<compile_context>
chip_gen: v5e
topology: v5e:2x2
jax: 0.10.0
libtpu: 0.0.40
codegen_flags: <defaults>
</compile_context>

<pallas_src>
import functools
import math

import jax
import jax.numpy as jnp
from jax.experimental import pallas as pl
from jax.experimental.pallas import tpu as pltpu


_SMALL_BYTES_THRESHOLD = 1 << 20   # below this, pallas_call launch overhead dominates
_VMEM_BUDGET_BYTES = 24 << 20      # double-buffered working-set budget (v7x-safe)
_MAX_TILE_ROWS = 1024              # keep enough grid steps for megacore sharding


def _small_kernel(x3_ref, x1_ref, out_ref, *, r3, r1, d, size):
    """Whole-array kernel for tiny shapes (no grid)."""
    x3 = x3_ref[...]
    x1 = x1_ref[...]
    # Body columns: rows [0:r3) from x3, rows [r3:r3+r1) from x1.
    out_ref[0:r3, 0:d] = x3
    out_ref[r3:r3 + r1, 0:d] = x1
    # Tail columns (t2 = t1[:, :size]) sourced directly from the inputs.
    if size > 0:
        out_ref[0:r3, d:d + size] = x3[:, :size]
        out_ref[r3:r3 + r1, d:d + size] = x1[:, :size]


def _tiled_kernel(x3_ref, x1_ref, out_ref, *, n3, d, size):
    """Row-tiled kernel: grid step i owns one (TILE_R, d+size) output block."""
    i = pl.program_id(0)

    def _write(src_ref):
        blk = src_ref[...]
        out_ref[:, 0:d] = blk
        if size > 0:
            out_ref[:, d:d + size] = blk[:, :size]

    @pl.when(i < n3)
    def _():
        _write(x3_ref)

    @pl.when(i >= n3)
    def _():
        _write(x1_ref)


def _pick_tile_rows(r3, r1, row_bytes, sublane):
    """Largest tile that divides both row counts, is sublane-aligned and fits VMEM."""
    g = math.gcd(r3, r1)
    best = None
    t = sublane
    limit = min(g, _MAX_TILE_ROWS)
    while t <= limit:
        if g % t == 0 and 2 * t * row_bytes <= _VMEM_BUDGET_BYTES:
            best = t
        t += sublane
    return best


def cat_slice_cat(x1, x2, x3, x4, size):
    """Pallas implementation of Model.forward(x1, x2, x3, x4, size)."""
    del x2, x4  # unused, matches PyTorch module
    r3, d3 = x3.shape
    r1, d1 = x1.shape
    assert d3 == d1, "cat along dim 0 requires matching feature dims"
    assert x1.dtype == x3.dtype, "cat requires matching dtypes"
    d = d3
    assert isinstance(size, int), "size must be a static Python int"
    assert 0 <= size <= d, f"size ({size}) must be in [0, {d}]"

    out_rows = r3 + r1
    out_cols = d + size
    itemsize = jnp.dtype(x1.dtype).itemsize
    out_shape = jax.ShapeDtypeStruct((out_rows, out_cols), x1.dtype)
    out_bytes = out_rows * out_cols * itemsize

    # Sublane tile grows for narrow dtypes (f32->8, bf16->16, int8->32 rows).
    sublane = 8 * max(1, 4 // itemsize)
    # Per-row VMEM traffic of one grid step (x3 block + x1 block + out block).
    row_bytes = (2 * d + out_cols) * itemsize

    tile_r = None
    if out_bytes >= _SMALL_BYTES_THRESHOLD and r3 > 0 and r1 > 0:
        tile_r = _pick_tile_rows(r3, r1, row_bytes, sublane)

    if tile_r is None:
        # Small / ragged shapes: single invocation, whole arrays in VMEM.
        kernel = functools.partial(_small_kernel, r3=r3, r1=r1, d=d, size=size)
        return pl.pallas_call(
            kernel,
            out_shape=out_shape,
            in_specs=[
                pl.BlockSpec(memory_space=pltpu.MemorySpace.VMEM),  # x3
                pl.BlockSpec(memory_space=pltpu.MemorySpace.VMEM),  # x1
            ],
            out_specs=pl.BlockSpec(memory_space=pltpu.MemorySpace.VMEM),
        )(x3, x1)

    n3 = r3 // tile_r
    n1 = r1 // tile_r
    kernel = functools.partial(_tiled_kernel, n3=n3, d=d, size=size)

    # Clamped index maps: each source's block index only advances while its
    # row range is active, so the pipeline does not re-fetch the other source.
    x3_spec = pl.BlockSpec((tile_r, d), lambda i: (jnp.minimum(i, n3 - 1), 0))
    x1_spec = pl.BlockSpec((tile_r, d), lambda i: (jnp.maximum(i - n3, 0), 0))
    out_spec = pl.BlockSpec((tile_r, out_cols), lambda i: (i, 0))

    return pl.pallas_call(
        kernel,
        out_shape=out_shape,
        grid_spec=pltpu.PrefetchScalarGridSpec(
            num_scalar_prefetch=0,
            grid=(n3 + n1,),
            in_specs=[x3_spec, x1_spec],
            out_specs=out_spec,
        ),
        compiler_params=pltpu.CompilerParams(
            dimension_semantics=("parallel",),   # megacore sharding on v7x
            vmem_limit_bytes=_VMEM_BUDGET_BYTES + (8 << 20),
        ),
    )(x3, x1)


if __name__ == "__main__":
    key = jax.random.PRNGKey(0)
    k1, k2, k3, k4, k5, k6 = jax.random.split(key, 6)

    # --- Small-shape case (the module's toy sizes; small/no-grid path) ---
    D = 64
    size = 1
    x1 = jax.random.normal(k1, (1, D), dtype=jnp.float32)
    x2 = jax.random.normal(k2, (1, D), dtype=jnp.float32)  # unused
    x3 = jax.random.normal(k3, (1, D), dtype=jnp.float32)
    x4 = jax.random.normal(k4, (1, D), dtype=jnp.float32)  # unused

    out = jax.block_until_ready(cat_slice_cat(x1, x2, x3, x4, size))
    t1 = jnp.concatenate([x3, x1], axis=0)
    ref = jnp.concatenate([t1, t1[:, :size]], axis=1)
    assert out.shape == (2, D + size), out.shape
    assert jnp.allclose(out, ref), "small-path mismatch vs reference"

    # --- Larger case exercising the row-tiled, megacore-parallel path ---
    D2, size2 = 256, 128
    xb1 = jax.random.normal(k5, (4096, D2), dtype=jnp.float32)
    xb3 = jax.random.normal(k6, (2048, D2), dtype=jnp.float32)
    out2 = jax.block_until_ready(cat_slice_cat(xb1, None, xb3, None, size2))
    t1b = jnp.concatenate([xb3, xb1], axis=0)
    refb = jnp.concatenate([t1b, t1b[:, :size2]], axis=1)
    assert out2.shape == (2048 + 4096, D2 + size2), out2.shape
    assert jnp.allclose(out2, refb), "tiled-path mismatch vs reference"

    print("KERNEL_OK")
</pallas_src>

<mosaic_0001>
module attributes {stable_mosaic.version = 11 : i64} {
  func.func @_small_kernel(%arg0: memref<1x64xf32, #tpu.memory_space<vmem>>, %arg1: memref<1x64xf32, #tpu.memory_space<vmem>>, %arg2: memref<2x65xf32, #tpu.memory_space<vmem>>) attributes {dimension_semantics = [], scalar_prefetch = 0 : i64, scratch_operands = 0 : i64, tpu.core_type = #tpu.core_type<tc>} {
    %c0 = arith.constant 0 : index
    %c0_0 = arith.constant 0 : index
    %0 = vector.load %arg0[%c0, %c0_0] : memref<1x64xf32, #tpu.memory_space<vmem>>, vector<1x64xf32>
    %c0_1 = arith.constant 0 : index
    %c0_2 = arith.constant 0 : index
    %1 = vector.load %arg1[%c0_1, %c0_2] : memref<1x64xf32, #tpu.memory_space<vmem>>, vector<1x64xf32>
    %c0_3 = arith.constant 0 : index
    %c0_4 = arith.constant 0 : index
    %2 = vector.load %arg2[%c0_3, %c0_4] : memref<2x65xf32, #tpu.memory_space<vmem>>, vector<1x64xf32>
    tpu.vector_store %arg2[%c0_3, %c0_4], %0 {strides = array<i32>} : memref<2x65xf32, #tpu.memory_space<vmem>>, vector<1x64xf32>,
    %c1 = arith.constant 1 : index
    %c0_5 = arith.constant 0 : index
    %3 = vector.load %arg2[%c1, %c0_5] : memref<2x65xf32, #tpu.memory_space<vmem>>, vector<1x64xf32>
    tpu.vector_store %arg2[%c1, %c0_5], %1 {strides = array<i32>} : memref<2x65xf32, #tpu.memory_space<vmem>>, vector<1x64xf32>,
    %4 = vector.extract_strided_slice %0 {offsets = [0, 0], sizes = [1, 1], strides = [1, 1]} : vector<1x64xf32> to vector<1x1xf32>
    %c0_6 = arith.constant 0 : index
    %c64 = arith.constant 64 : index
    %5 = vector.load %arg2[%c0_6, %c64] : memref<2x65xf32, #tpu.memory_space<vmem>>, vector<1x1xf32>
    tpu.vector_store %arg2[%c0_6, %c64], %4 {strides = array<i32>} : memref<2x65xf32, #tpu.memory_space<vmem>>, vector<1x1xf32>,
    %6 = vector.extract_strided_slice %1 {offsets = [0, 0], sizes = [1, 1], strides = [1, 1]} : vector<1x64xf32> to vector<1x1xf32>
    %c1_7 = arith.constant 1 : index
    %c64_8 = arith.constant 64 : index
    %7 = vector.load %arg2[%c1_7, %c64_8] : memref<2x65xf32, #tpu.memory_space<vmem>>, vector<1x1xf32>
    tpu.vector_store %arg2[%c1_7, %c64_8], %6 {strides = array<i32>} : memref<2x65xf32, #tpu.memory_space<vmem>>, vector<1x1xf32>,
    return
  }
}

</mosaic_0001>

<bundles_post_ra>
// kernel: tpu_custom_call.1
= control target key start
LH: loop header
LB: loop body
LE: loop exit
PB: predicated region body
PF: predicated region fallthrough
CT: control target
= control target key end

     0   :  { %7 = vsyncpa [#allocation3], 0  ;;  %s187_s0 = inlined_call_operand.hbm [shape: f32[1,64], index: 0, kind: input, shape index: {}]   ;;  %s188_s1 = inlined_call_operand.hbm [shape: f32[1,64], index: 1, kind: input, shape index: {}]   ;;  %s189_s2 = inlined_call_operand.hbm [shape: f32[2,65], index: 2, kind: output, shape index: {}]  }
   0x1   :  { %8 = vsyncpa [#allocation6], 0 }
   0x2   :  { %9 = vsyncpa [#allocation4], 0  ;;  %s15_s11 = sshll.u32 %s187_s0, 4  ;;  %s159_s12 = smov [#allocation2]   ;;  %s16_s11 = int_to_ptr.hbm [resolvable:$true] %s15_s11 }
   0x3   :  { %s17_s13 = sshll.u32 %s159_s12, 4  ;;  %s26_s16 = sshll.u32 %s188_s1, 4  ;;  %s18_s13 = int_to_ptr.vmem [resolvable:$true] %s17_s13  ;;  %s27_s16 = int_to_ptr.hbm [resolvable:$true] %s26_s16 }
   0x4   :  { %20 = dma.hbm_to_vmem [thread:$0]  %s16_s11, 16, %s18_s13, [#allocation3]  }
   0x5   :  { %s160_s17 = smov [#allocation5]  }
   0x6   :  { %s28_s18 = sshll.u32 %s160_s17, 4  ;;  %s29_s18 = int_to_ptr.vmem [resolvable:$true] %s28_s18 }
   0x7   :  { %31 = dma.hbm_to_vmem [thread:$0]  %s27_s16, 16, %s29_s18, [#allocation6]  }
   0x8   :  { %153 = dma.done.wait [#allocation3], 16  }
   0x9   :  { %154 = vsyncadd [#allocation3], 4294967280 }
   0xa   :  { %155 = dma.done.wait [#allocation6], 16  }
   0xb   :  { %156 = vsyncadd [#allocation6], 4294967280  ;;  %vm42_vm0 = vcmask 516096   ;;  %v40_v0 = vld [vmem:[#allocation2] sm:$0x1]  ;;  %s161_s0 = smov 64  }
   0xc   :  { %v80_v1 = vld [vmem:[#allocation2] ss:$0 sm:$0xff]  ;;  %43 = vst.msk [vmem:[#allocation7] sm:$0x1] %vm42_vm0, %v40_v0  ;;  %v41_v2 = vld [vmem:[#allocation5] sm:$0x1] }
   0xd   :  { %47 = vrot.lane.b32.xlu0 %v80_v1, %s161_s0  ;;  %44 = vst.msk [vmem:[#allocation7 + $0x1] sm:$0x1] %vm42_vm0, %v41_v2  ;;  %v53_v3 = vperm.slane %v41_v2, 0  ;;  %vm50_vm1 = vcmask 524800   ;;  %s162_s1 = smov [#allocation7]   ;;  %s65_s22 = sshll.u32 %s189_s2, 4  ;;  %s66_s22 = int_to_ptr.hbm [resolvable:$true] %s65_s22 }
   0xe   :  { %s63_s19 = sshll.u32 %s162_s1, 4  ;;  %s64_s19 = int_to_ptr.vmem [resolvable:$true] %s63_s19 }
  0x15   :  { %54 = vrot.lane.b32.xlu0 %v53_v3, %s161_s0 }
  0x7f   :  { %v48_v4 = vpop.permute.xlu0 %47 }
  0x80   :  { %51 = vst.msk [vmem:[#allocation7] sm:$0x1] %vm50_vm1, %v48_v4 }
  0x87   :  { %v55_v5 = vpop.permute.xlu0 %54 }
  0x88   :  { %57 = vst.msk [vmem:[#allocation7 + $0x1] sm:$0x1] %vm50_vm1, %v55_v5 }
  0x89   :  { %68 = dma.vmem_to_hbm [thread:$0]  %s64_s19, 32, %s66_s22, [#allocation4]  }
  0x8a   :  { %157 = dma.done.wait [#allocation4], 32  }
  0x8b   :  { %158 = vsyncadd [#allocation4], 4294967264 }
  0x8c   :  { %73 = vsyncpa [#allocation3], 1 }
  0x8d   :  { %74 = vsyncpa [#allocation6], 1 }
  0x8e   :  { %75 = vsyncpa [#allocation4], 1 }

</bundles_post_ra>
